<compile_context>
chip_gen: v5e
topology: v5e:2x2
jax: 0.10.0
libtpu: 0.0.40
codegen_flags: <defaults>
</compile_context>

<pallas_src>
import jax
import jax.numpy as jnp
from jax.experimental import pallas as pl
from jax.experimental.pallas import tpu as pltpu

HIDDEN = 64
QROWS = 8  # q_out weight zero-padded to 8 output rows (sublane granularity)


def _cdiv(a, b):
    return -(-a // b)


def _round_up(x, m):
    return _cdiv(x, m) * m


# ---------------------------------------------------------------------------
# Kernel: one (D, TM) batch tile (features on sublanes, batch on lanes)
# through all four layers.  Weights/biases are VMEM-resident full-array
# blocks; matmuls accumulate in f32 on the MXU; intermediates are bf16.
# ---------------------------------------------------------------------------
def _critic_kernel(x_ref,
                   w1_ref, b1_ref,
                   w2_ref, b2_ref,
                   w3_ref, b3_ref,
                   w4_ref, b4_ref,
                   q_ref):
    # Layer 1: merged state||action input, K = obs+act.
    h = jnp.dot(w1_ref[...], x_ref[...], preferred_element_type=jnp.float32)
    h = jnp.maximum(h + b1_ref[...], 0.0).astype(jnp.bfloat16)       # (64, TM)

    h = jnp.dot(w2_ref[...], h, preferred_element_type=jnp.float32)
    h = jnp.maximum(h + b2_ref[...], 0.0).astype(jnp.bfloat16)       # (64, TM)

    h = jnp.dot(w3_ref[...], h, preferred_element_type=jnp.float32)
    h = jnp.maximum(h + b3_ref[...], 0.0).astype(jnp.bfloat16)       # (64, TM)

    # q head: weight zero-padded to 8 rows; only row 0 is real.  Storing just
    # that row keeps the output lane-dense at 4 B per batch element.
    q = jnp.dot(w4_ref[...], h, preferred_element_type=jnp.float32)  # (8, TM)
    q_ref[...] = (q + b4_ref[...])[0:1, :]                           # (1, TM)


def _choose_tiling(batch, max_tm, lane=128):
    """Pick (tile, padded_batch, n_tiles): tiles are 128-aligned, padding is
    based on cdiv(batch, n_tiles), and the tile count is kept even when the
    batch is split so both v7x TensorCores get work."""
    n_tiles = _cdiv(batch, max_tm)
    if n_tiles > 1 and n_tiles % 2:
        n_tiles += 1
    tm = _round_up(_cdiv(batch, n_tiles), lane)
    return tm, tm * n_tiles, n_tiles


def critic_forward(state_list, action_list, params, *, max_tm=4096):
    """state_list / action_list: lists of (B, d_i) arrays.  params: dict of
    bf16 weights stored (out, in) (nn.Linear layout) + f32 (out, 1) biases."""
    # torch.cat glue stays in plain JAX; a single (B, obs+act) bf16 array is
    # transposed to the kernel's (features, batch) layout.
    state = jnp.concatenate(state_list, axis=1)
    action = jnp.concatenate(action_list, axis=1)
    x = jnp.concatenate([state, action], axis=1).astype(jnp.bfloat16)  # (B, D)
    batch, d_in = x.shape
    assert d_in == params["w1"].shape[1]

    tm, b_pad, n_tiles = _choose_tiling(batch, max_tm)
    x_t = x.T                                                          # (D, B)
    if b_pad != batch:
        x_t = jnp.pad(x_t, ((0, 0), (0, b_pad - batch)))

    def batch_tile(rows):
        return pl.BlockSpec((rows, tm), lambda i: (0, i))

    def resident(shape):
        # Same block index every grid step -> loaded once, stays in VMEM.
        return pl.BlockSpec(shape, lambda i: (0, 0))

    in_specs = [
        batch_tile(d_in),                 # x_t
        resident((HIDDEN, d_in)),         # w1
        resident((HIDDEN, 1)),            # b1
        resident((HIDDEN, HIDDEN)),       # w2
        resident((HIDDEN, 1)),            # b2
        resident((HIDDEN, HIDDEN)),       # w3
        resident((HIDDEN, 1)),            # b3
        resident((QROWS, HIDDEN)),        # w4 (zero-padded rows)
        resident((QROWS, 1)),             # b4 (zero-padded rows)
    ]

    weight_bytes = sum(int(v.size) * v.dtype.itemsize for v in params.values())
    flops = 2 * b_pad * (d_in * HIDDEN + 2 * HIDDEN * HIDDEN + HIDDEN * QROWS)
    cost = pl.CostEstimate(
        flops=flops,
        transcendentals=0,
        bytes_accessed=int(x_t.size) * 2 + b_pad * 4 + weight_bytes,
    )

    q_row = pl.pallas_call(
        _critic_kernel,
        out_shape=jax.ShapeDtypeStruct((1, b_pad), jnp.float32),
        grid=(n_tiles,),
        in_specs=in_specs,
        out_specs=batch_tile(1),
        compiler_params=pltpu.CompilerParams(
            dimension_semantics=("parallel",),
            vmem_limit_bytes=32 * 1024 * 1024,
        ),
        cost_estimate=cost,
    )(
        x_t,
        params["w1"], params["b1"],
        params["w2"], params["b2"],
        params["w3"], params["b3"],
        params["w4"], params["b4"],
    )

    # Drop the batch padding; q lives in row 0.
    return q_row[0, :batch].reshape(batch, 1)


# ---------------------------------------------------------------------------
# Deterministic parameter construction (mimics nn.Linear U(-1/sqrt(fan_in))
# init).  Weights stored (out, in) in bf16; biases (out, 1) in f32; the final
# layer is zero-padded from 1 to QROWS output rows.
# ---------------------------------------------------------------------------
def init_critic_params(obs_shape, action_shape, key):
    def uniform(k, shape, fan_in):
        bound = 1.0 / (fan_in ** 0.5)
        return jax.random.uniform(k, shape, jnp.float32, -bound, bound)

    d_in = obs_shape + action_shape
    k1w, k1b, k2w, k2b, k3w, k3b, k4w, k4b = jax.random.split(key, 8)

    params = {
        "w1": uniform(k1w, (HIDDEN, d_in), d_in).astype(jnp.bfloat16),
        "b1": uniform(k1b, (HIDDEN, 1), d_in),
        "w2": uniform(k2w, (HIDDEN, HIDDEN), HIDDEN).astype(jnp.bfloat16),
        "b2": uniform(k2b, (HIDDEN, 1), HIDDEN),
        "w3": uniform(k3w, (HIDDEN, HIDDEN), HIDDEN).astype(jnp.bfloat16),
        "b3": uniform(k3b, (HIDDEN, 1), HIDDEN),
    }
    w4 = uniform(k4w, (1, HIDDEN), HIDDEN)
    b4 = uniform(k4b, (1, 1), HIDDEN)
    # Zero-pad (not garbage-pad) the extra rows so the stored q is unchanged.
    params["w4"] = jnp.pad(w4, ((0, QROWS - 1), (0, 0))).astype(jnp.bfloat16)
    params["b4"] = jnp.pad(b4, ((0, QROWS - 1), (0, 0)))
    return params


if __name__ == "__main__":
    # Small synthetic setup: 2 agents, per-agent obs dim 3 (obs_shape = 6),
    # per-agent action dim 5 (action_shape = 10), batch = 4.
    batch = 4
    n_agents = 2
    per_obs, per_act = 3, 5
    obs_shape = n_agents * per_obs        # 6
    action_shape = n_agents * per_act     # 10

    key = jax.random.PRNGKey(0)
    key, kp = jax.random.split(key)
    params = init_critic_params(obs_shape, action_shape, kp)

    state_list, action_list = [], []
    for _ in range(n_agents):
        key, ks, ka = jax.random.split(key, 3)
        state_list.append(jax.random.normal(ks, (batch, per_obs), jnp.float32))
        action_list.append(jax.random.normal(ka, (batch, per_act), jnp.float32))

    q = critic_forward(state_list, action_list, params)
    q = jax.block_until_ready(q)

    # Pure-JAX reference replicating the kernel's mixed precision (bf16
    # inputs/weights, f32 accumulation, bf16 intermediates).
    # NOTE: relative to a true f32 PyTorch Critic the bf16 cast of inputs /
    # weights loses ~3 significant digits; acceptable for RL inference.
    f32 = jnp.float32
    x = jnp.concatenate([jnp.concatenate(state_list, 1),
                         jnp.concatenate(action_list, 1)], axis=1)
    x_t = x.astype(jnp.bfloat16).astype(f32).T                        # (D, B)
    h = jnp.maximum(params["w1"].astype(f32) @ x_t + params["b1"], 0.0)
    h = h.astype(jnp.bfloat16).astype(f32)
    h = jnp.maximum(params["w2"].astype(f32) @ h + params["b2"], 0.0)
    h = h.astype(jnp.bfloat16).astype(f32)
    h = jnp.maximum(params["w3"].astype(f32) @ h + params["b3"], 0.0)
    h = h.astype(jnp.bfloat16).astype(f32)
    q_ref = (params["w4"][0:1].astype(f32) @ h + params["b4"][0:1]).T  # (B, 1)

    assert q.shape == (batch, 1)
    assert jnp.allclose(q, q_ref, atol=1e-2, rtol=1e-2), (q, q_ref)
    print("KERNEL_OK")
</pallas_src>

<mosaic_0001>
module attributes {stable_mosaic.version = 11 : i64} {
  func.func @_critic_kernel(%arg0: i32, %arg1: memref<16x128xbf16, #tpu.memory_space<vmem>>, %arg2: memref<64x16xbf16, #tpu.memory_space<vmem>>, %arg3: memref<64x1xf32, #tpu.memory_space<vmem>>, %arg4: memref<64x64xbf16, #tpu.memory_space<vmem>>, %arg5: memref<64x1xf32, #tpu.memory_space<vmem>>, %arg6: memref<64x64xbf16, #tpu.memory_space<vmem>>, %arg7: memref<64x1xf32, #tpu.memory_space<vmem>>, %arg8: memref<8x64xbf16, #tpu.memory_space<vmem>>, %arg9: memref<8x1xf32, #tpu.memory_space<vmem>>, %arg10: memref<1x128xf32, #tpu.memory_space<vmem>>) attributes {dimension_semantics = [#tpu.dimension_semantics<parallel>], iteration_bounds = array<i64: 1>, scalar_prefetch = 0 : i64, scratch_operands = 0 : i64, tpu.core_type = #tpu.core_type<tc>, window_params = [{transform_indices = @transform_0, window_bounds = array<i64: 16, 128>}, {pipeline_mode = #tpu.pipeline_mode<synchronous>, transform_indices = @transform_1, window_bounds = array<i64: 64, 16>}, {pipeline_mode = #tpu.pipeline_mode<synchronous>, transform_indices = @transform_2, window_bounds = array<i64: 64, 1>}, {pipeline_mode = #tpu.pipeline_mode<synchronous>, transform_indices = @transform_3, window_bounds = array<i64: 64, 64>}, {pipeline_mode = #tpu.pipeline_mode<synchronous>, transform_indices = @transform_4, window_bounds = array<i64: 64, 1>}, {pipeline_mode = #tpu.pipeline_mode<synchronous>, transform_indices = @transform_5, window_bounds = array<i64: 64, 64>}, {pipeline_mode = #tpu.pipeline_mode<synchronous>, transform_indices = @transform_6, window_bounds = array<i64: 64, 1>}, {pipeline_mode = #tpu.pipeline_mode<synchronous>, transform_indices = @transform_7, window_bounds = array<i64: 8, 64>}, {pipeline_mode = #tpu.pipeline_mode<synchronous>, transform_indices = @transform_8, window_bounds = array<i64: 8, 1>}, {transform_indices = @transform_9, window_bounds = array<i64: 1, 128>}]} {
    %c0 = arith.constant 0 : index
    %c0_0 = arith.constant 0 : index
    %0 = vector.load %arg2[%c0, %c0_0] : memref<64x16xbf16, #tpu.memory_space<vmem>>, vector<64x16xbf16>
    %c0_1 = arith.constant 0 : index
    %c0_2 = arith.constant 0 : index
    %1 = vector.load %arg1[%c0_1, %c0_2] : memref<16x128xbf16, #tpu.memory_space<vmem>>, vector<16x128xbf16>
    %cst = arith.constant dense<0.000000e+00> : vector<64x128xf32>
    %2 = tpu.matmul %0, %1, %cst {dimension_numbers = #tpu.dot_dimension_numbers<[1], [0], [0], [1], [0, 0, 1, 1], [], []>} : vector<64x16xbf16>, vector<16x128xbf16>, vector<64x128xf32> -> vector<64x128xf32>
    %c0_3 = arith.constant 0 : index
    %c0_4 = arith.constant 0 : index
    %3 = vector.load %arg3[%c0_3, %c0_4] : memref<64x1xf32, #tpu.memory_space<vmem>>, vector<64x1xf32>
    %4 = vector.broadcast %3 : vector<64x1xf32> to vector<64x128xf32>
    %5 = arith.addf %2, %4 : vector<64x128xf32>
    %cst_5 = arith.constant 0.000000e+00 : f32
    %6 = vector.broadcast %cst_5 : f32 to vector<64x128xf32>
    %7 = arith.maximumf %5, %6 : vector<64x128xf32>
    %8 = arith.truncf %7 : vector<64x128xf32> to vector<64x128xbf16>
    %c0_6 = arith.constant 0 : index
    %c0_7 = arith.constant 0 : index
    %9 = vector.load %arg4[%c0_6, %c0_7] : memref<64x64xbf16, #tpu.memory_space<vmem>>, vector<64x64xbf16>
    %cst_8 = arith.constant dense<0.000000e+00> : vector<64x128xf32>
    %10 = tpu.matmul %9, %8, %cst_8 {dimension_numbers = #tpu.dot_dimension_numbers<[1], [0], [0], [1], [0, 0, 1, 1], [], []>} : vector<64x64xbf16>, vector<64x128xbf16>, vector<64x128xf32> -> vector<64x128xf32>
    %c0_9 = arith.constant 0 : index
    %c0_10 = arith.constant 0 : index
    %11 = vector.load %arg5[%c0_9, %c0_10] : memref<64x1xf32, #tpu.memory_space<vmem>>, vector<64x1xf32>
    %12 = vector.broadcast %11 : vector<64x1xf32> to vector<64x128xf32>
    %13 = arith.addf %10, %12 : vector<64x128xf32>
    %cst_11 = arith.constant 0.000000e+00 : f32
    %14 = vector.broadcast %cst_11 : f32 to vector<64x128xf32>
    %15 = arith.maximumf %13, %14 : vector<64x128xf32>
    %16 = arith.truncf %15 : vector<64x128xf32> to vector<64x128xbf16>
    %c0_12 = arith.constant 0 : index
    %c0_13 = arith.constant 0 : index
    %17 = vector.load %arg6[%c0_12, %c0_13] : memref<64x64xbf16, #tpu.memory_space<vmem>>, vector<64x64xbf16>
    %cst_14 = arith.constant dense<0.000000e+00> : vector<64x128xf32>
    %18 = tpu.matmul %17, %16, %cst_14 {dimension_numbers = #tpu.dot_dimension_numbers<[1], [0], [0], [1], [0, 0, 1, 1], [], []>} : vector<64x64xbf16>, vector<64x128xbf16>, vector<64x128xf32> -> vector<64x128xf32>
    %c0_15 = arith.constant 0 : index
    %c0_16 = arith.constant 0 : index
    %19 = vector.load %arg7[%c0_15, %c0_16] : memref<64x1xf32, #tpu.memory_space<vmem>>, vector<64x1xf32>
    %20 = vector.broadcast %19 : vector<64x1xf32> to vector<64x128xf32>
    %21 = arith.addf %18, %20 : vector<64x128xf32>
    %cst_17 = arith.constant 0.000000e+00 : f32
    %22 = vector.broadcast %cst_17 : f32 to vector<64x128xf32>
    %23 = arith.maximumf %21, %22 : vector<64x128xf32>
    %24 = arith.truncf %23 : vector<64x128xf32> to vector<64x128xbf16>
    %c0_18 = arith.constant 0 : index
    %c0_19 = arith.constant 0 : index
    %25 = vector.load %arg8[%c0_18, %c0_19] : memref<8x64xbf16, #tpu.memory_space<vmem>>, vector<8x64xbf16>
    %cst_20 = arith.constant dense<0.000000e+00> : vector<8x128xf32>
    %26 = tpu.matmul %25, %24, %cst_20 {dimension_numbers = #tpu.dot_dimension_numbers<[1], [0], [0], [1], [0, 0, 1, 1], [], []>} : vector<8x64xbf16>, vector<64x128xbf16>, vector<8x128xf32> -> vector<8x128xf32>
    %c0_21 = arith.constant 0 : index
    %c0_22 = arith.constant 0 : index
    %27 = vector.load %arg9[%c0_21, %c0_22] : memref<8x1xf32, #tpu.memory_space<vmem>>, vector<8x1xf32>
    %28 = vector.broadcast %27 : vector<8x1xf32> to vector<8x128xf32>
    %29 = arith.addf %26, %28 : vector<8x128xf32>
    %30 = vector.extract_strided_slice %29 {offsets = [0, 0], sizes = [1, 128], strides = [1, 1]} : vector<8x128xf32> to vector<1x128xf32>
    %c0_23 = arith.constant 0 : index
    %c0_24 = arith.constant 0 : index
    %31 = vector.load %arg10[%c0_23, %c0_24] : memref<1x128xf32, #tpu.memory_space<vmem>>, vector<1x128xf32>
    tpu.vector_store %arg10[%c0_23, %c0_24], %30 {strides = array<i32>} : memref<1x128xf32, #tpu.memory_space<vmem>>, vector<1x128xf32>,
    return
  }
  func.func @transform_0(%arg0: i32) -> (i32, i32) {
    %c0_i32 = arith.constant 0 : i32
    %c0_i32_0 = arith.constant 0 : i32
    return %c0_i32, %arg0 : i32, i32
  }
  func.func @transform_1(%arg0: i32) -> (i32, i32) {
    %c0_i32 = arith.constant 0 : i32
    %c0_i32_0 = arith.constant 0 : i32
    %c0_i32_1 = arith.constant 0 : i32
    return %c0_i32, %c0_i32_0 : i32, i32
  }
  func.func @transform_2(%arg0: i32) -> (i32, i32) {
    %c0_i32 = arith.constant 0 : i32
    %c0_i32_0 = arith.constant 0 : i32
    %c0_i32_1 = arith.constant 0 : i32
    return %c0_i32, %c0_i32_0 : i32, i32
  }
  func.func @transform_3(%arg0: i32) -> (i32, i32) {
    %c0_i32 = arith.constant 0 : i32
    %c0_i32_0 = arith.constant 0 : i32
    %c0_i32_1 = arith.constant 0 : i32
    return %c0_i32, %c0_i32_0 : i32, i32
  }
  func.func @transform_4(%arg0: i32) -> (i32, i32) {
    %c0_i32 = arith.constant 0 : i32
    %c0_i32_0 = arith.constant 0 : i32
    %c0_i32_1 = arith.constant 0 : i32
    return %c0_i32, %c0_i32_0 : i32, i32
  }
  func.func @transform_5(%arg0: i32) -> (i32, i32) {
    %c0_i32 = arith.constant 0 : i32
    %c0_i32_0 = arith.constant 0 : i32
    %c0_i32_1 = arith.constant 0 : i32
    return %c0_i32, %c0_i32_0 : i32, i32
  }
  func.func @transform_6(%arg0: i32) -> (i32, i32) {
    %c0_i32 = arith.constant 0 : i32
    %c0_i32_0 = arith.constant 0 : i32
    %c0_i32_1 = arith.constant 0 : i32
    return %c0_i32, %c0_i32_0 : i32, i32
  }
  func.func @transform_7(%arg0: i32) -> (i32, i32) {
    %c0_i32 = arith.constant 0 : i32
    %c0_i32_0 = arith.constant 0 : i32
    %c0_i32_1 = arith.constant 0 : i32
    return %c0_i32, %c0_i32_0 : i32, i32
  }
  func.func @transform_8(%arg0: i32) -> (i32, i32) {
    %c0_i32 = arith.constant 0 : i32
    %c0_i32_0 = arith.constant 0 : i32
    %c0_i32_1 = arith.constant 0 : i32
    return %c0_i32, %c0_i32_0 : i32, i32
  }
  func.func @transform_9(%arg0: i32) -> (i32, i32) {
    %c0_i32 = arith.constant 0 : i32
    %c0_i32_0 = arith.constant 0 : i32
    return %c0_i32, %arg0 : i32, i32
  }
}

</mosaic_0001>

<bundles_post_ra>
// kernel: tpu_custom_call.1
= control target key start
LH: loop header
LB: loop body
LE: loop exit
PB: predicated region body
PF: predicated region fallthrough
CT: control target
= control target key end

     0   :  { %v580_v2 = vmov 0   ;;  %vm118_vm0 = vcmask 130048   ;;  %s765_s0 = inlined_call_operand.vmem [shape: bf16[16,128], index: 0, kind: input, shape index: {}]   ;;  %s766_s1 = inlined_call_operand.vmem [shape: bf16[64,16], index: 1, kind: input, shape index: {}]   ;;  %s767_s2 = inlined_call_operand.vmem [shape: f32[64,1], index: 2, kind: input, shape index: {}]   ;;  %s768_s3 = inlined_call_operand.vmem [shape: bf16[64,64], index: 3, kind: input, shape index: {}]   ;;  %s769_s4 = inlined_call_operand.vmem [shape: f32[64,1], index: 4, kind: input, shape index: {}]   ;;  %s770_s5 = inlined_call_operand.vmem [shape: bf16[64,64], index: 5, kind: input, shape index: {}]   ;;  %s771_s6 = inlined_call_operand.vmem [shape: f32[64,1], index: 6, kind: input, shape index: {}]   ;;  %s772_s7 = inlined_call_operand.vmem [shape: bf16[8,64], index: 7, kind: input, shape index: {}]   ;;  %s773_s8 = inlined_call_operand.vmem [shape: f32[8,1], index: 8, kind: input, shape index: {}]   ;;  %s774_s9 = inlined_call_operand.hbm [shape: f32[1,128], index: 9, kind: output, shape index: {}]  }
   0x1   :  { %v50_v0 = vld [vmem:[%s767_s2 + $0x30] sm:$0xff]  ;;  %v540_v1 = vld [vmem:[%s765_s0] sm:$0xff]  ;;  %551 = vset.pattern.permute.xlu0 %v580_v2  ;;  %552 = vset.pattern.permute.xlu1 %v580_v2 }
   0x2   :  { %v536_v3 = vld [vmem:[%s766_s1] sm:$0xff]  ;;  %84 = vperm.xlu0 %551, %v50_v0   ;;  %138 = vmatpush.bf16.msra.mxu0 %v540_v1 }
   0x3   :  { %v48_v4 = vld [vmem:[%s767_s2 + $0x20] sm:$0xff]  ;;  %553 = vset.pattern.permute.xlu2 %v580_v2 }
   0x4   :  { %74 = vperm.xlu1 %552, %v48_v4  }
   0x5   :  { %14 = vsyncpa [#allocation3], 0  ;;  %491 = vmatmul.msk.bf16.vlgmr.msra.gmra.mxu0 %vm118_vm0, %v536_v3  ;;  %v46_v5 = vld [vmem:[%s767_s2 + $0x10] sm:$0xff]  ;;  %v51_v6 = vld [vmem:[%s767_s2 + $0x38] sm:$0xff]  ;;  %vm248_vm1 = vcmask 523264   ;;  %s581_s12 = smov [#allocation2]  }
   0x6   :  { %64 = vperm.xlu2 %553, %v46_v5   ;;  %v49_v7 = vld [vmem:[%s767_s2 + $0x28] sm:$0xff]  ;;  %v47_v8 = vld [vmem:[%s767_s2 + $0x18] sm:$0xff]  ;;  %v44_v9 = vld [vmem:[%s767_s2] sm:$0xff]  ;;  %s460_s13 = sshll.u32 %s581_s12, 4  ;;  %s462_s15 = sshll.u32 %s774_s9, 4  ;;  %s461_s13 = int_to_ptr.vmem [resolvable:$true] %s460_s13  ;;  %s463_s15 = int_to_ptr.hbm [resolvable:$true] %s462_s15 }
   0x7   :  { %v45_v10 = vld [vmem:[%s767_s2 + $0x8] sm:$0xff]  ;;  %v186_v12 = vld [vmem:[%s769_s4 + $0x30] sm:$0xff]  ;;  %v187_v13 = vld [vmem:[%s769_s4 + $0x38] sm:$0xff] }
   0x8   :  { %v537_v11 = vld [vmem:[%s766_s1 + $0x8] sm:$0xff]  ;;  %v184_v14 = vld [vmem:[%s769_s4 + $0x20] sm:$0xff]  ;;  %v182_v16 = vld [vmem:[%s769_s4 + $0x10] sm:$0xff] }
   0x9   :  { %v185_v15 = vld [vmem:[%s769_s4 + $0x28] sm:$0xff]  ;;  %v183_v17 = vld [vmem:[%s769_s4 + $0x18] sm:$0xff]  ;;  %v538_v18 = vld [vmem:[%s766_s1 + $0x10] sm:$0xff] }
   0xa   :  { %89 = vperm.xlu0 %551, %v51_v6   ;;  %v180_v19 = vld [vmem:[%s769_s4] sm:$0xff]  ;;  %v181_v20 = vld [vmem:[%s769_s4 + $0x8] sm:$0xff]  ;;  %v316_v21 = vld [vmem:[%s771_s6 + $0x30] sm:$0xff] }
   0xb   :  { %v317_v22 = vld [vmem:[%s771_s6 + $0x38] sm:$0xff]  ;;  %v314_v23 = vld [vmem:[%s771_s6 + $0x20] sm:$0xff]  ;;  %v315_v24 = vld [vmem:[%s771_s6 + $0x28] sm:$0xff] }
   0xc   :  { %79 = vperm.xlu1 %552, %v49_v7   ;;  %v539_v25 = vld [vmem:[%s766_s1 + $0x18] sm:$0xff]  ;;  %v312_v26 = vld [vmem:[%s771_s6 + $0x10] sm:$0xff]  ;;  %v310_v28 = vld [vmem:[%s771_s6] sm:$0xff] }
   0xd   :  { %v313_v27 = vld [vmem:[%s771_s6 + $0x18] sm:$0xff]  ;;  %v311_v29 = vld [vmem:[%s771_s6 + $0x8] sm:$0xff]  ;;  %v432_v30 = vld [vmem:[%s773_s8] sm:$0xff] }
   0xe   :  { %69 = vperm.xlu2 %553, %v47_v8   ;;  %v541_v3 = vld [vmem:[%s768_s3] sm:$0xff]  ;;  %v542_v4 = vld [vmem:[%s768_s3 + $0x8] sm:$0xff]  ;;  %v543_v5 = vld [vmem:[%s768_s3 + $0x10] sm:$0xff] }
   0xf   :  { %v544_v6 = vld [vmem:[%s768_s3 + $0x18] sm:$0xff] }
  0x12   :  { %54 = vperm.xlu0 %551, %v44_v9  }
  0x14   :  { %59 = vperm.xlu1 %552, %v45_v10  }
  0x15   :  { %492 = vmatmul.msk.bf16.gmra.mxu0 %vm118_vm0, %v537_v11 }
  0x16   :  { %220 = vperm.xlu2 %553, %v186_v12  }
  0x1a   :  { %225 = vperm.xlu0 %551, %v187_v13  }
  0x1c   :  { %210 = vperm.xlu1 %552, %v184_v14  }
  0x1e   :  { %215 = vperm.xlu2 %553, %v185_v15  }
  0x22   :  { %200 = vperm.xlu0 %551, %v182_v16  }
  0x24   :  { %205 = vperm.xlu1 %552, %v183_v17  }
  0x25   :  { %493 = vmatmul.msk.bf16.gmra.mxu0 %vm118_vm0, %v538_v18 }
  0x26   :  { %190 = vperm.xlu2 %553, %v180_v19  }
  0x2a   :  { %195 = vperm.xlu0 %551, %v181_v20  }
  0x2c   :  { %350 = vperm.xlu1 %552, %v316_v21  }
  0x2e   :  { %355 = vperm.xlu2 %553, %v317_v22  }
  0x32   :  { %340 = vperm.xlu0 %551, %v314_v23  }
  0x34   :  { %345 = vperm.xlu1 %552, %v315_v24  }
  0x35   :  { %494 = vmatmul.msk.bf16.gmra.mxu0 %vm118_vm0, %v539_v25 }
  0x36   :  { %330 = vperm.xlu2 %553, %v312_v26  }
  0x3a   :  { %335 = vperm.xlu0 %551, %v313_v27  }
  0x3c   :  { %320 = vperm.xlu1 %552, %v310_v28  }
  0x3e   :  { %325 = vperm.xlu2 %553, %v311_v29  }
  0x42   :  { %435 = vperm.xlu0 %551, %v432_v30  }
  0x60   :  { %v65_v40 = vpop.permute.xlu2 %64 }
  0x68   :  { %v70_v50 = vpop.permute.xlu2 %69 }
  0x70   :  { %v221_v14 = vpop.permute.xlu2 %220 }
  0x74   :  { %v85_v38 = vpop.permute.xlu0 %84 }
  0x76   :  { %v75_v37 = vpop.permute.xlu1 %74 }
  0x78   :  { %v216_v19 = vpop.permute.xlu2 %215 }
  0x7c   :  { %v90_v42 = vpop.permute.xlu0 %89 }
  0x7e   :  { %v80_v41 = vpop.permute.xlu1 %79 }
  0x82   :  { %v140_v31 = vpop.f32.mrf.mxu0 }
  0x84   :  { %v55_v57 = vpop.permute.xlu0 %54 }
  0x85   :  { %v141_v61 = vadd.f32 %v140_v31, %v55_v57 }
  0x86   :  { %v60_v54 = vpop.permute.xlu1 %59 }
  0x87   :  { %v160_v1 = vmax.f32 %v141_v61, 0.0 }
  0x8a   :  { %v142_v32 = vpop.f32.mrf.mxu0 }
  0x8b   :  { %v143_v58 = vadd.f32 %v142_v32, %v60_v54 }
  0x8c   :  { %v226_v13 = vpop.permute.xlu0 %225 }
  0x8d   :  { %v161_v63 = vmax.f32 %v143_v58, 0.0 }
  0x8e   :  { %v211_v16 = vpop.permute.xlu1 %210 }
  0x8f   :  { %v168_v2 = vpack.c.bf16 %v161_v63, %v160_v1 }
  0x92   :  { %v145_v33 = vpop.f32.mrf.mxu0 }
  0x93   :  { %v146_v55 = vadd.f32 %v145_v33, %v65_v40 }
  0x94   :  { %v201_v17 = vpop.permute.xlu0 %200 }
  0x95   :  { %v162_v62 = vmax.f32 %v146_v55, 0.0 }
  0x96   :  { %v206_v26 = vpop.permute.xlu1 %205 }
  0x9a   :  { %v147_v34 = vpop.f32.mrf.mxu0 }
  0x9b   :  { %v148_v51 = vadd.f32 %v147_v34, %v70_v50 }
  0x9c   :  { %v196_v32 = vpop.permute.xlu0 %195 }
  0x9d   :  { %v163_v59 = vmax.f32 %v148_v51, 0.0 }
  0x9e   :  { %v351_v54 = vpop.permute.xlu1 %350 }
  0x9f   :  { %v169_v0 = vpack.c.bf16 %v163_v59, %v162_v62 }
  0xa2   :  { %v150_v35 = vpop.f32.mrf.mxu0 }
  0xa3   :  { %v151_v47 = vadd.f32 %v150_v35, %v75_v37 }
  0xa5   :  { %v164_v56 = vmax.f32 %v151_v47, 0.0 }
  0xa6   :  { %v346_v59 = vpop.permute.xlu1 %345 }
  0xaa   :  { %v152_v36 = vpop.f32.mrf.mxu0 }
  0xab   :  { %v153_v45 = vadd.f32 %v152_v36, %v80_v41  ;;  %v191_v36 = vpop.permute.xlu2 %190 }
  0xad   :  { %v165_v52 = vmax.f32 %v153_v45, 0.0  ;;  %v547_v45 = vld [vmem:[%s770_s5 + $0x10] sm:$0xff] }
  0xaf   :  { %v170_v60 = vpack.c.bf16 %v165_v52, %v164_v56  ;;  %v341_v56 = vpop.permute.xlu0 %340 }
  0xb2   :  { %v155_v39 = vpop.f32.mrf.mxu0 }
  0xb3   :  { %v156_v43 = vadd.f32 %v155_v39, %v85_v38 }
  0xb5   :  { %v166_v48 = vmax.f32 %v156_v43, 0.0  ;;  %v545_v43 = vld [vmem:[%s770_s5] sm:$0xff] }
  0xba   :  { %v157_v44 = vpop.f32.mrf.mxu0 }
  0xbb   :  { %v158_v46 = vadd.f32 %v157_v44, %v90_v42  ;;  %v546_v44 = vld [vmem:[%s770_s5 + $0x8] sm:$0xff] }
  0xbd   :  { %v167_v49 = vmax.f32 %v158_v46, 0.0  ;;  %v548_v46 = vld [vmem:[%s770_s5 + $0x18] sm:$0xff] }
  0xbf   :  { %v171_v53 = vpack.c.bf16 %v167_v49, %v166_v48 }
  0xc1   :  { %265 = vmatpush.bf16.msra.mxu1 %v171_v53  ;;  %v356_v53 = vpop.permute.xlu2 %355 }
  0xc5   :  { %266 = vmatpush.bf16.msra.mxu1 %v170_v60 }
  0xc9   :  { %267 = vmatpush.bf16.msra.mxu1 %v169_v0  ;;  %v331_v57 = vpop.permute.xlu2 %330 }
  0xcd   :  { %268 = vmatpush.bf16.msra.mxu1 %v168_v2  ;;  %v336_v2 = vpop.permute.xlu0 %335 }
  0xd0   :  { %511 = vmatmul.msk.bf16.vlgmr.msra.gmra.mxu1 %vm248_vm1, %v541_v3 }
  0xe0   :  { %512 = vmatmul.msk.bf16.gmra.mxu1 %vm248_vm1, %v542_v4 }
  0xf0   :  { %513 = vmatmul.msk.bf16.gmra.mxu1 %vm248_vm1, %v543_v5 }
 0x100   :  { %514 = vmatmul.msk.bf16.gmra.mxu1 %vm248_vm1, %v544_v6 }
 0x14d   :  { %v270_v7 = vpop.f32.mrf.mxu1 }
 0x14e   :  { %v271_v37 = vadd.f32 %v270_v7, %v191_v36 }
 0x150   :  { %v290_v41 = vmax.f32 %v271_v37, 0.0 }
 0x155   :  { %v272_v8 = vpop.f32.mrf.mxu1 }
 0x156   :  { %v273_v33 = vadd.f32 %v272_v8, %v196_v32  ;;  %v326_v8 = vpop.permute.xlu2 %325 }
 0x158   :  { %v291_v39 = vmax.f32 %v273_v33, 0.0 }
 0x15a   :  { %v298_v42 = vpack.c.bf16 %v291_v39, %v290_v41 }
 0x15d   :  { %v275_v9 = vpop.f32.mrf.mxu1 }
 0x15e   :  { %v276_v30 = vadd.f32 %v275_v9, %v201_v17 }
 0x160   :  { %v292_v38 = vmax.f32 %v276_v30, 0.0 }
 0x165   :  { %v277_v10 = vpop.f32.mrf.mxu1 }
 0x166   :  { %v278_v27 = vadd.f32 %v277_v10, %v206_v26 }
 0x168   :  { %v293_v34 = vmax.f32 %v278_v27, 0.0 }
 0x16a   :  { %v299_v40 = vpack.c.bf16 %v293_v34, %v292_v38 }
 0x16d   :  { %v280_v11 = vpop.f32.mrf.mxu1 }
 0x16e   :  { %v281_v23 = vadd.f32 %v280_v11, %v211_v16 }
 0x170   :  { %v294_v31 = vmax.f32 %v281_v23, 0.0 }
 0x175   :  { %v282_v12 = vpop.f32.mrf.mxu1 }
 0x176   :  { %v283_v21 = vadd.f32 %v282_v12, %v216_v19  ;;  %v321_v12 = vpop.permute.xlu1 %320  ;;  %v431_v19 = vld [vmem:[%s772_s7] sm:$0xf] }
 0x178   :  { %v295_v28 = vmax.f32 %v283_v21, 0.0 }
 0x17a   :  { %v300_v35 = vpack.c.bf16 %v295_v28, %v294_v31 }
 0x17d   :  { %v285_v15 = vpop.f32.mrf.mxu1 }
 0x17e   :  { %v286_v18 = vadd.f32 %v285_v15, %v221_v14 }
 0x180   :  { %v296_v24 = vmax.f32 %v286_v18, 0.0 }
 0x185   :  { %v287_v20 = vpop.f32.mrf.mxu1 }
 0x186   :  { %v288_v22 = vadd.f32 %v287_v20, %v226_v13  ;;  %v436_v20 = vpop.permute.xlu0 %435 }
 0x188   :  { %v297_v25 = vmax.f32 %v288_v22, 0.0 }
 0x18a   :  { %v301_v29 = vpack.c.bf16 %v297_v25, %v296_v24 }
 0x18c   :  { %394 = vmatpush.bf16.msra.mxu2 %v301_v29 }
 0x190   :  { %395 = vmatpush.bf16.msra.mxu2 %v300_v35 }
 0x194   :  { %396 = vmatpush.bf16.msra.mxu2 %v299_v40 }
 0x198   :  { %397 = vmatpush.bf16.msra.mxu2 %v298_v42 }
 0x19b   :  { %531 = vmatmul.msk.bf16.vlgmr.msra.gmra.mxu2 %vm248_vm1, %v545_v43 }
 0x1ab   :  { %532 = vmatmul.msk.bf16.gmra.mxu2 %vm248_vm1, %v546_v44 }
 0x1bb   :  { %533 = vmatmul.msk.bf16.gmra.mxu2 %vm248_vm1, %v547_v45 }
 0x1cb   :  { %534 = vmatmul.msk.bf16.gmra.mxu2 %vm248_vm1, %v548_v46 }
 0x21e   :  { %v399_v47 = vpop.f32.mrf.mxu2 }
 0x21f   :  { %v400_v13 = vadd.f32 %v399_v47, %v321_v12 }
 0x221   :  { %v419_v17 = vmax.f32 %v400_v13, 0.0 }
 0x226   :  { %v401_v48 = vpop.f32.mrf.mxu2 }
 0x227   :  { %v402_v9 = vadd.f32 %v401_v48, %v326_v8 }
 0x229   :  { %v420_v15 = vmax.f32 %v402_v9, 0.0 }
 0x22b   :  { %v427_v18 = vpack.c.bf16 %v420_v15, %v419_v17 }
 0x22e   :  { %v404_v49 = vpop.f32.mrf.mxu2 }
 0x22f   :  { %v405_v6 = vadd.f32 %v404_v49, %v331_v57 }
 0x231   :  { %v421_v14 = vmax.f32 %v405_v6, 0.0 }
 0x236   :  { %v406_v50 = vpop.f32.mrf.mxu2 }
 0x237   :  { %v407_v3 = vadd.f32 %v406_v50, %v336_v2 }
 0x239   :  { %v422_v10 = vmax.f32 %v407_v3, 0.0 }
 0x23b   :  { %v428_v16 = vpack.c.bf16 %v422_v10, %v421_v14 }
 0x23e   :  { %v409_v51 = vpop.f32.mrf.mxu2 }
 0x23f   :  { %v410_v63 = vadd.f32 %v409_v51, %v341_v56 }
 0x241   :  { %v423_v7 = vmax.f32 %v410_v63, 0.0 }
 0x246   :  { %v411_v52 = vpop.f32.mrf.mxu2 }
 0x247   :  { %v412_v61 = vadd.f32 %v411_v52, %v346_v59 }
 0x249   :  { %v424_v4 = vmax.f32 %v412_v61, 0.0 }
 0x24b   :  { %v429_v11 = vpack.c.bf16 %v424_v4, %v423_v7 }
 0x24e   :  { %v414_v55 = vpop.f32.mrf.mxu2 }
 0x24f   :  { %v415_v58 = vadd.f32 %v414_v55, %v351_v54 }
 0x251   :  { %v425_v0 = vmax.f32 %v415_v58, 0.0 }
 0x256   :  { %v416_v60 = vpop.f32.mrf.mxu2 }
 0x257   :  { %v417_v62 = vadd.f32 %v416_v60, %v356_v53 }
 0x259   :  { %v426_v1 = vmax.f32 %v417_v62, 0.0 }
 0x25b   :  { %v430_v5 = vpack.c.bf16 %v426_v1, %v425_v0 }
 0x25d   :  { %445 = vmatpush.bf16.msra.mxu3 %v430_v5 }
 0x261   :  { %446 = vmatpush.bf16.msra.mxu3 %v429_v11 }
 0x265   :  { %447 = vmatpush.bf16.msra.mxu3 %v428_v16 }
 0x269   :  { %448 = vmatpush.bf16.msra.mxu3 %v427_v18 }
 0x26c   :  { %535 = vmatmul.msk.bf16.vlgmr.msra.gmra.mxu3 %vm248_vm1, %v431_v19 }
 0x2ef   :  { %v450_v21 = vpop.f32.mrf.mxu3 }
 0x2f0   :  { %v451_v22 = vadd.f32 %v450_v21, %v436_v20 }
 0x2f2   :  { %454 = vst [vmem:[#allocation2] sm:$0x1] %v451_v22 }
 0x2f3   :  { %465 = dma.vmem_to_hbm [thread:$0]  %s461_s13, 16, %s463_s15, [#allocation3]  }
 0x2f7   :  { %v452_v23 = vpop.f32.mrf.mxu3 }
 0x2f8   :  { %578 = dma.done.wait [#allocation3], 16  }
 0x2f9   :  { %579 = vsyncadd [#allocation3], 4294967280 }
 0x2fa   :  { %470 = vsyncpa [#allocation3], 1 }

</bundles_post_ra>
